<compile_context>
chip_gen: v7x
topology: tpu7x:2x2x1
jax: 0.10.0
libtpu: 0.0.40
codegen_flags: <defaults>
</compile_context>

<pallas_src>
import jax
import jax.numpy as jnp
import numpy as np
from jax.experimental import pallas as pl
from jax.experimental.pallas import tpu as pltpu


def eresidual_kernel(x_ref, wb1_ref, b1_ref, wb2_ref, b2_ref, w3_ref, b3_ref,
                     out_ref, pad_ref):
    # x_ref / out_ref : (1, H, W*C) f32
    # wb1_ref/wb2_ref : (3, W*C, W*C) bf16 banded 3x3-conv weights (one per dy)
    # w3_ref          : (W*C, W*C) bf16 block-diagonal 1x1-conv weight
    # b*_ref          : (1, W*C) f32
    # pad_ref         : (H + 2, W*C) bf16 scratch; rows 0 and H+1 are the halo.
    H = x_ref.shape[1]
    WC = x_ref.shape[2]

    # Zero only the two halo rows (cheap; done every step so correctness does
    # not depend on which core / grid index touches the scratch first).
    zero_row = jnp.zeros((1, WC), pad_ref.dtype)
    pad_ref[0:1, :] = zero_row
    pad_ref[H + 1:H + 2, :] = zero_row

    x = x_ref[0]  # (H, W*C) f32 -- kept in f32 for the residual add.

    def conv3x3(wb_ref, b_ref):
        # Three (H, WC) x (WC, WC) bf16 matmuls (one per kernel row dy),
        # accumulated in f32 on the MXU; bias + ReLU epilogue in f32.
        acc = jnp.dot(pad_ref[0:H, :], wb_ref[0],
                      preferred_element_type=jnp.float32)
        acc = acc + jnp.dot(pad_ref[1:H + 1, :], wb_ref[1],
                            preferred_element_type=jnp.float32)
        acc = acc + jnp.dot(pad_ref[2:H + 2, :], wb_ref[2],
                            preferred_element_type=jnp.float32)
        return jnp.maximum(acc + b_ref[...], 0.0)

    # ---- conv1 (3x3, pad 1) + ReLU -----------------------------------------
    pad_ref[1:H + 1, :] = x.astype(pad_ref.dtype)
    h1 = conv3x3(wb1_ref, b1_ref)

    # ---- conv2 (3x3, pad 1) + ReLU -----------------------------------------
    pad_ref[1:H + 1, :] = h1.astype(pad_ref.dtype)
    h2 = conv3x3(wb2_ref, b2_ref)

    # ---- conv3 (1x1) + fused bias + residual + ReLU epilogue ---------------
    h3 = jnp.dot(h2.astype(w3_ref.dtype), w3_ref[...],
                 preferred_element_type=jnp.float32)
    out_ref[0] = jnp.maximum(h3 + b3_ref[...] + x, 0.0)


def _banded_conv3x3_weights(w_hwio, W):
    """Fold the kw (dx) taps, cin and the W-direction zero padding of a 3x3
    'same' conv into three banded (W*cin, W*cout) matrices (one per dy)."""
    kh, kw, cin, cout = w_hwio.shape
    bands = []
    for dy in range(kh):
        acc = jnp.zeros((W * cin, W * cout), w_hwio.dtype)
        for dx in range(kw):
            # Input column (w + dx - 1) feeds output column w; out-of-range
            # columns are the implicit zero padding (entries simply dropped).
            shift = np.eye(W, k=1 - dx, dtype=np.float32)
            acc = acc + jnp.kron(jnp.asarray(shift, w_hwio.dtype),
                                 w_hwio[dy, dx])
        bands.append(acc)
    return jnp.stack(bands)  # (3, W*cin, W*cout)


def eresidual_block(x_nhwc, params):
    """x_nhwc: (B, H, W, C) float32. params: HWIO conv weights + (1,C) biases."""
    B, H, W, C = x_nhwc.shape
    WC = W * C
    x_flat = x_nhwc.reshape(B, H, WC)

    # One-time weight preprocessing (layout plumbing, outside the kernel).
    wb1 = _banded_conv3x3_weights(params["w1"], W).astype(jnp.bfloat16)
    wb2 = _banded_conv3x3_weights(params["w2"], W).astype(jnp.bfloat16)
    w3b = jnp.kron(jnp.eye(W, dtype=params["w3"].dtype),
                   params["w3"]).astype(jnp.bfloat16)          # (WC, WC)
    b1 = jnp.tile(params["b1"].reshape(-1), W).reshape(1, WC)
    b2 = jnp.tile(params["b2"].reshape(-1), W).reshape(1, WC)
    b3 = jnp.tile(params["b3"].reshape(-1), W).reshape(1, WC)

    full = lambda shape: pl.BlockSpec(shape, lambda b: (0,) * len(shape))

    out_flat = pl.pallas_call(
        eresidual_kernel,
        out_shape=jax.ShapeDtypeStruct((B, H, WC), jnp.float32),
        grid_spec=pltpu.PrefetchScalarGridSpec(
            num_scalar_prefetch=0,
            grid=(B,),
            in_specs=[
                pl.BlockSpec((1, H, WC), lambda b: (b, 0, 0)),  # x
                full((3, WC, WC)),  # banded conv1 weight
                full((1, WC)),      # b1
                full((3, WC, WC)),  # banded conv2 weight
                full((1, WC)),      # b2
                full((WC, WC)),     # block-diagonal 1x1 weight
                full((1, WC)),      # b3
            ],
            out_specs=pl.BlockSpec((1, H, WC), lambda b: (b, 0, 0)),
            scratch_shapes=[pltpu.VMEM((H + 2, WC), jnp.bfloat16)],
        ),
        compiler_params=pltpu.CompilerParams(
            dimension_semantics=("parallel",),
            vmem_limit_bytes=32 * 1024 * 1024),
    )(x_flat, wb1, b1, wb2, b2, w3b, b3)

    return out_flat.reshape(B, H, W, C)


def reference_forward(x_nhwc, params):
    """Pure-JAX reference with matching bf16-matmul / f32-accumulate math."""
    bf16 = jnp.bfloat16

    def conv(x, w, b, pad):
        y = jax.lax.conv_general_dilated(
            x.astype(bf16), w.astype(bf16),
            window_strides=(1, 1),
            padding=[(pad, pad), (pad, pad)],
            dimension_numbers=("NHWC", "HWIO", "NHWC"),
            preferred_element_type=jnp.float32)
        return y + b.reshape(1, 1, 1, -1)

    h = jax.nn.relu(conv(x_nhwc, params["w1"], params["b1"], 1))
    h = jax.nn.relu(conv(h, params["w2"], params["b2"], 1))
    h = conv(h, params["w3"].reshape(1, 1, *params["w3"].shape),
             params["b3"], 0)
    return jax.nn.relu(h + x_nhwc)


def make_params(key, C):
    ks = jax.random.split(key, 6)
    return {
        "w1": 0.1 * jax.random.normal(ks[0], (3, 3, C, C), jnp.float32),
        "b1": 0.1 * jax.random.normal(ks[1], (1, C), jnp.float32),
        "w2": 0.1 * jax.random.normal(ks[2], (3, 3, C, C), jnp.float32),
        "b2": 0.1 * jax.random.normal(ks[3], (1, C), jnp.float32),
        "w3": 0.1 * jax.random.normal(ks[4], (C, C), jnp.float32),
        "b3": 0.1 * jax.random.normal(ks[5], (1, C), jnp.float32),
    }


if __name__ == "__main__":
    B, C, H, W = 2, 4, 16, 16  # in_channels == out_channels (residual add)
    key = jax.random.PRNGKey(0)
    kx, kp = jax.random.split(key)

    x_nchw = jax.random.normal(kx, (B, C, H, W), jnp.float32)  # PyTorch layout
    x_nhwc = jnp.transpose(x_nchw, (0, 2, 3, 1))               # kernel layout
    params = make_params(kp, C)

    out_nhwc = eresidual_block(x_nhwc, params)
    out_nhwc = jax.block_until_ready(out_nhwc)

    ref = reference_forward(x_nhwc, params)
    max_err = float(jnp.max(jnp.abs(out_nhwc - ref)))
    if not jnp.allclose(out_nhwc, ref, atol=2e-2, rtol=2e-2):
        raise AssertionError(
            f"Pallas kernel mismatch vs reference (max abs err {max_err})")

    # Back to NCHW to match PyTorch output convention (not printed).
    _ = jnp.transpose(out_nhwc, (0, 3, 1, 2))
    print("KERNEL_OK")
</pallas_src>

<mosaic_0001>
module attributes {stable_mosaic.version = 11 : i64} {
  func.func @eresidual_kernel(%arg0: i32, %arg1: memref<1x16x64xf32, #tpu.memory_space<vmem>>, %arg2: memref<3x64x64xbf16, #tpu.memory_space<vmem>>, %arg3: memref<1x64xf32, #tpu.memory_space<vmem>>, %arg4: memref<3x64x64xbf16, #tpu.memory_space<vmem>>, %arg5: memref<1x64xf32, #tpu.memory_space<vmem>>, %arg6: memref<64x64xbf16, #tpu.memory_space<vmem>>, %arg7: memref<1x64xf32, #tpu.memory_space<vmem>>, %arg8: memref<1x16x64xf32, #tpu.memory_space<vmem>>, %arg9: memref<18x64xbf16, #tpu.memory_space<vmem>>) attributes {dimension_semantics = [#tpu.dimension_semantics<parallel>], iteration_bounds = array<i64: 2>, scalar_prefetch = 0 : i64, scratch_operands = 1 : i64, tpu.core_type = #tpu.core_type<tc>, window_params = [{transform_indices = @transform_0, window_bounds = array<i64: 1, 16, 64>}, {pipeline_mode = #tpu.pipeline_mode<synchronous>, transform_indices = @transform_1, window_bounds = array<i64: 3, 64, 64>}, {pipeline_mode = #tpu.pipeline_mode<synchronous>, transform_indices = @transform_2, window_bounds = array<i64: 1, 64>}, {pipeline_mode = #tpu.pipeline_mode<synchronous>, transform_indices = @transform_3, window_bounds = array<i64: 3, 64, 64>}, {pipeline_mode = #tpu.pipeline_mode<synchronous>, transform_indices = @transform_4, window_bounds = array<i64: 1, 64>}, {pipeline_mode = #tpu.pipeline_mode<synchronous>, transform_indices = @transform_5, window_bounds = array<i64: 64, 64>}, {pipeline_mode = #tpu.pipeline_mode<synchronous>, transform_indices = @transform_6, window_bounds = array<i64: 1, 64>}, {transform_indices = @transform_7, window_bounds = array<i64: 1, 16, 64>}]} {
    %cst = arith.constant 0.000000e+00 : bf16
    %0 = vector.broadcast %cst : bf16 to vector<1x64xbf16>
    %c0 = arith.constant 0 : index
    %c0_0 = arith.constant 0 : index
    %1 = vector.load %arg9[%c0, %c0_0] : memref<18x64xbf16, #tpu.memory_space<vmem>>, vector<1x64xbf16>
    tpu.vector_store %arg9[%c0, %c0_0], %0 {strides = array<i32>} : memref<18x64xbf16, #tpu.memory_space<vmem>>, vector<1x64xbf16>,
    %c17 = arith.constant 17 : index
    %c0_1 = arith.constant 0 : index
    %2 = vector.load %arg9[%c17, %c0_1] : memref<18x64xbf16, #tpu.memory_space<vmem>>, vector<1x64xbf16>
    tpu.vector_store %arg9[%c17, %c0_1], %0 {strides = array<i32>} : memref<18x64xbf16, #tpu.memory_space<vmem>>, vector<1x64xbf16>,
    %c0_2 = arith.constant 0 : index
    %c0_3 = arith.constant 0 : index
    %c0_4 = arith.constant 0 : index
    %3 = vector.load %arg1[%c0_2, %c0_3, %c0_4] : memref<1x16x64xf32, #tpu.memory_space<vmem>>, vector<1x16x64xf32>
    %4 = vector.shape_cast %3 : vector<1x16x64xf32> to vector<16x64xf32>
    %5 = arith.truncf %4 : vector<16x64xf32> to vector<16x64xbf16>
    %c1 = arith.constant 1 : index
    %c0_5 = arith.constant 0 : index
    %6 = vector.load %arg9[%c1, %c0_5] : memref<18x64xbf16, #tpu.memory_space<vmem>>, vector<16x64xbf16>
    tpu.vector_store %arg9[%c1, %c0_5], %5 {strides = array<i32>} : memref<18x64xbf16, #tpu.memory_space<vmem>>, vector<16x64xbf16>,
    %c0_6 = arith.constant 0 : index
    %c0_7 = arith.constant 0 : index
    %7 = vector.load %arg9[%c0_6, %c0_7] : memref<18x64xbf16, #tpu.memory_space<vmem>>, vector<16x64xbf16>
    %c0_8 = arith.constant 0 : index
    %c0_9 = arith.constant 0 : index
    %c0_10 = arith.constant 0 : index
    %8 = vector.load %arg2[%c0_8, %c0_9, %c0_10] : memref<3x64x64xbf16, #tpu.memory_space<vmem>>, vector<1x64x64xbf16>
    %9 = vector.shape_cast %8 : vector<1x64x64xbf16> to vector<64x64xbf16>
    %cst_11 = arith.constant dense<0.000000e+00> : vector<16x64xf32>
    %10 = tpu.matmul %7, %9, %cst_11 {dimension_numbers = #tpu.dot_dimension_numbers<[1], [0], [0], [1], [0, 0, 1, 1], [], []>} : vector<16x64xbf16>, vector<64x64xbf16>, vector<16x64xf32> -> vector<16x64xf32>
    %c1_12 = arith.constant 1 : index
    %c0_13 = arith.constant 0 : index
    %11 = vector.load %arg9[%c1_12, %c0_13] : memref<18x64xbf16, #tpu.memory_space<vmem>>, vector<16x64xbf16>
    %c1_14 = arith.constant 1 : index
    %c0_15 = arith.constant 0 : index
    %c0_16 = arith.constant 0 : index
    %12 = vector.load %arg2[%c1_14, %c0_15, %c0_16] : memref<3x64x64xbf16, #tpu.memory_space<vmem>>, vector<1x64x64xbf16>
    %13 = vector.shape_cast %12 : vector<1x64x64xbf16> to vector<64x64xbf16>
    %cst_17 = arith.constant dense<0.000000e+00> : vector<16x64xf32>
    %14 = tpu.matmul %11, %13, %cst_17 {dimension_numbers = #tpu.dot_dimension_numbers<[1], [0], [0], [1], [0, 0, 1, 1], [], []>} : vector<16x64xbf16>, vector<64x64xbf16>, vector<16x64xf32> -> vector<16x64xf32>
    %15 = arith.addf %10, %14 : vector<16x64xf32>
    %c2 = arith.constant 2 : index
    %c0_18 = arith.constant 0 : index
    %16 = vector.load %arg9[%c2, %c0_18] : memref<18x64xbf16, #tpu.memory_space<vmem>>, vector<16x64xbf16>
    %c2_19 = arith.constant 2 : index
    %c0_20 = arith.constant 0 : index
    %c0_21 = arith.constant 0 : index
    %17 = vector.load %arg2[%c2_19, %c0_20, %c0_21] : memref<3x64x64xbf16, #tpu.memory_space<vmem>>, vector<1x64x64xbf16>
    %18 = vector.shape_cast %17 : vector<1x64x64xbf16> to vector<64x64xbf16>
    %cst_22 = arith.constant dense<0.000000e+00> : vector<16x64xf32>
    %19 = tpu.matmul %16, %18, %cst_22 {dimension_numbers = #tpu.dot_dimension_numbers<[1], [0], [0], [1], [0, 0, 1, 1], [], []>} : vector<16x64xbf16>, vector<64x64xbf16>, vector<16x64xf32> -> vector<16x64xf32>
    %20 = arith.addf %15, %19 : vector<16x64xf32>
    %c0_23 = arith.constant 0 : index
    %c0_24 = arith.constant 0 : index
    %21 = vector.load %arg3[%c0_23, %c0_24] : memref<1x64xf32, #tpu.memory_space<vmem>>, vector<1x64xf32>
    %22 = vector.broadcast %21 : vector<1x64xf32> to vector<16x64xf32>
    %23 = arith.addf %20, %22 : vector<16x64xf32>
    %cst_25 = arith.constant 0.000000e+00 : f32
    %24 = vector.broadcast %cst_25 : f32 to vector<16x64xf32>
    %25 = arith.maximumf %23, %24 : vector<16x64xf32>
    %26 = arith.truncf %25 : vector<16x64xf32> to vector<16x64xbf16>
    %c1_26 = arith.constant 1 : index
    %c0_27 = arith.constant 0 : index
    %27 = vector.load %arg9[%c1_26, %c0_27] : memref<18x64xbf16, #tpu.memory_space<vmem>>, vector<16x64xbf16>
    tpu.vector_store %arg9[%c1_26, %c0_27], %26 {strides = array<i32>} : memref<18x64xbf16, #tpu.memory_space<vmem>>, vector<16x64xbf16>,
    %c0_28 = arith.constant 0 : index
    %c0_29 = arith.constant 0 : index
    %28 = vector.load %arg9[%c0_28, %c0_29] : memref<18x64xbf16, #tpu.memory_space<vmem>>, vector<16x64xbf16>
    %c0_30 = arith.constant 0 : index
    %c0_31 = arith.constant 0 : index
    %c0_32 = arith.constant 0 : index
    %29 = vector.load %arg4[%c0_30, %c0_31, %c0_32] : memref<3x64x64xbf16, #tpu.memory_space<vmem>>, vector<1x64x64xbf16>
    %30 = vector.shape_cast %29 : vector<1x64x64xbf16> to vector<64x64xbf16>
    %cst_33 = arith.constant dense<0.000000e+00> : vector<16x64xf32>
    %31 = tpu.matmul %28, %30, %cst_33 {dimension_numbers = #tpu.dot_dimension_numbers<[1], [0], [0], [1], [0, 0, 1, 1], [], []>} : vector<16x64xbf16>, vector<64x64xbf16>, vector<16x64xf32> -> vector<16x64xf32>
    %c1_34 = arith.constant 1 : index
    %c0_35 = arith.constant 0 : index
    %32 = vector.load %arg9[%c1_34, %c0_35] : memref<18x64xbf16, #tpu.memory_space<vmem>>, vector<16x64xbf16>
    %c1_36 = arith.constant 1 : index
    %c0_37 = arith.constant 0 : index
    %c0_38 = arith.constant 0 : index
    %33 = vector.load %arg4[%c1_36, %c0_37, %c0_38] : memref<3x64x64xbf16, #tpu.memory_space<vmem>>, vector<1x64x64xbf16>
    %34 = vector.shape_cast %33 : vector<1x64x64xbf16> to vector<64x64xbf16>
    %cst_39 = arith.constant dense<0.000000e+00> : vector<16x64xf32>
    %35 = tpu.matmul %32, %34, %cst_39 {dimension_numbers = #tpu.dot_dimension_numbers<[1], [0], [0], [1], [0, 0, 1, 1], [], []>} : vector<16x64xbf16>, vector<64x64xbf16>, vector<16x64xf32> -> vector<16x64xf32>
    %36 = arith.addf %31, %35 : vector<16x64xf32>
    %c2_40 = arith.constant 2 : index
    %c0_41 = arith.constant 0 : index
    %37 = vector.load %arg9[%c2_40, %c0_41] : memref<18x64xbf16, #tpu.memory_space<vmem>>, vector<16x64xbf16>
    %c2_42 = arith.constant 2 : index
    %c0_43 = arith.constant 0 : index
    %c0_44 = arith.constant 0 : index
    %38 = vector.load %arg4[%c2_42, %c0_43, %c0_44] : memref<3x64x64xbf16, #tpu.memory_space<vmem>>, vector<1x64x64xbf16>
    %39 = vector.shape_cast %38 : vector<1x64x64xbf16> to vector<64x64xbf16>
    %cst_45 = arith.constant dense<0.000000e+00> : vector<16x64xf32>
    %40 = tpu.matmul %37, %39, %cst_45 {dimension_numbers = #tpu.dot_dimension_numbers<[1], [0], [0], [1], [0, 0, 1, 1], [], []>} : vector<16x64xbf16>, vector<64x64xbf16>, vector<16x64xf32> -> vector<16x64xf32>
    %41 = arith.addf %36, %40 : vector<16x64xf32>
    %c0_46 = arith.constant 0 : index
    %c0_47 = arith.constant 0 : index
    %42 = vector.load %arg5[%c0_46, %c0_47] : memref<1x64xf32, #tpu.memory_space<vmem>>, vector<1x64xf32>
    %43 = vector.broadcast %42 : vector<1x64xf32> to vector<16x64xf32>
    %44 = arith.addf %41, %43 : vector<16x64xf32>
    %cst_48 = arith.constant 0.000000e+00 : f32
    %45 = vector.broadcast %cst_48 : f32 to vector<16x64xf32>
    %46 = arith.maximumf %44, %45 : vector<16x64xf32>
    %47 = arith.truncf %46 : vector<16x64xf32> to vector<16x64xbf16>
    %c0_49 = arith.constant 0 : index
    %c0_50 = arith.constant 0 : index
    %48 = vector.load %arg6[%c0_49, %c0_50] : memref<64x64xbf16, #tpu.memory_space<vmem>>, vector<64x64xbf16>
    %cst_51 = arith.constant dense<0.000000e+00> : vector<16x64xf32>
    %49 = tpu.matmul %47, %48, %cst_51 {dimension_numbers = #tpu.dot_dimension_numbers<[1], [0], [0], [1], [0, 0, 1, 1], [], []>} : vector<16x64xbf16>, vector<64x64xbf16>, vector<16x64xf32> -> vector<16x64xf32>
    %c0_52 = arith.constant 0 : index
    %c0_53 = arith.constant 0 : index
    %50 = vector.load %arg7[%c0_52, %c0_53] : memref<1x64xf32, #tpu.memory_space<vmem>>, vector<1x64xf32>
    %51 = vector.broadcast %50 : vector<1x64xf32> to vector<16x64xf32>
    %52 = arith.addf %49, %51 : vector<16x64xf32>
    %53 = arith.addf %52, %4 : vector<16x64xf32>
    %cst_54 = arith.constant 0.000000e+00 : f32
    %54 = vector.broadcast %cst_54 : f32 to vector<16x64xf32>
    %55 = arith.maximumf %53, %54 : vector<16x64xf32>
    %c0_55 = arith.constant 0 : index
    %c0_56 = arith.constant 0 : index
    %c0_57 = arith.constant 0 : index
    %56 = vector.load %arg8[%c0_55, %c0_56, %c0_57] : memref<1x16x64xf32, #tpu.memory_space<vmem>>, vector<1x16x64xf32>
    %57 = vector.shape_cast %56 : vector<1x16x64xf32> to vector<16x64xf32>
    %58 = vector.shape_cast %55 : vector<16x64xf32> to vector<1x16x64xf32>
    tpu.vector_store %arg8[%c0_55, %c0_56, %c0_57], %58 {strides = array<i32>} : memref<1x16x64xf32, #tpu.memory_space<vmem>>, vector<1x16x64xf32>,
    return
  }
  func.func @transform_0(%arg0: i32) -> (i32, i32, i32) {
    %c0_i32 = arith.constant 0 : i32
    %c0_i32_0 = arith.constant 0 : i32
    %c0_i32_1 = arith.constant 0 : i32
    return %arg0, %c0_i32, %c0_i32_0 : i32, i32, i32
  }
  func.func @transform_1(%arg0: i32) -> (i32, i32, i32) {
    %c0_i32 = arith.constant 0 : i32
    %c0_i32_0 = arith.constant 0 : i32
    %c0_i32_1 = arith.constant 0 : i32
    %c0_i32_2 = arith.constant 0 : i32
    return %c0_i32, %c0_i32_0, %c0_i32_1 : i32, i32, i32
  }
  func.func @transform_2(%arg0: i32) -> (i32, i32) {
    %c0_i32 = arith.constant 0 : i32
    %c0_i32_0 = arith.constant 0 : i32
    %c0_i32_1 = arith.constant 0 : i32
    return %c0_i32, %c0_i32_0 : i32, i32
  }
  func.func @transform_3(%arg0: i32) -> (i32, i32, i32) {
    %c0_i32 = arith.constant 0 : i32
    %c0_i32_0 = arith.constant 0 : i32
    %c0_i32_1 = arith.constant 0 : i32
    %c0_i32_2 = arith.constant 0 : i32
    return %c0_i32, %c0_i32_0, %c0_i32_1 : i32, i32, i32
  }
  func.func @transform_4(%arg0: i32) -> (i32, i32) {
    %c0_i32 = arith.constant 0 : i32
    %c0_i32_0 = arith.constant 0 : i32
    %c0_i32_1 = arith.constant 0 : i32
    return %c0_i32, %c0_i32_0 : i32, i32
  }
  func.func @transform_5(%arg0: i32) -> (i32, i32) {
    %c0_i32 = arith.constant 0 : i32
    %c0_i32_0 = arith.constant 0 : i32
    %c0_i32_1 = arith.constant 0 : i32
    return %c0_i32, %c0_i32_0 : i32, i32
  }
  func.func @transform_6(%arg0: i32) -> (i32, i32) {
    %c0_i32 = arith.constant 0 : i32
    %c0_i32_0 = arith.constant 0 : i32
    %c0_i32_1 = arith.constant 0 : i32
    return %c0_i32, %c0_i32_0 : i32, i32
  }
  func.func @transform_7(%arg0: i32) -> (i32, i32, i32) {
    %c0_i32 = arith.constant 0 : i32
    %c0_i32_0 = arith.constant 0 : i32
    %c0_i32_1 = arith.constant 0 : i32
    return %arg0, %c0_i32, %c0_i32_0 : i32, i32, i32
  }
}

</mosaic_0001>

<bundles_post_ra>
// kernel: tpu_custom_call.1
= control target key start
LH: loop header
LB: loop body
LE: loop exit
PB: predicated region body
PF: predicated region fallthrough
CT: control target
= control target key end

     0   :  { %12 = vsyncpa [#allocation4], 0  ;;  %s2127_s0 = inlined_call_operand.hbm [shape: f32[2,16,64], index: 0, kind: input, shape index: {}]   ;;  %s2128_s1 = inlined_call_operand.hbm [shape: bf16[3,64,64], index: 1, kind: input, shape index: {}]   ;;  %s2129_s2 = inlined_call_operand.vmem [shape: f32[1,64], index: 2, kind: input, shape index: {}]   ;;  %s2130_s3 = inlined_call_operand.hbm [shape: bf16[3,64,64], index: 3, kind: input, shape index: {}]   ;;  %s2131_s4 = inlined_call_operand.vmem [shape: f32[1,64], index: 4, kind: input, shape index: {}]   ;;  %s2132_s5 = inlined_call_operand.hbm [shape: bf16[64,64], index: 5, kind: input, shape index: {}]   ;;  %s2133_s6 = inlined_call_operand.vmem [shape: f32[1,64], index: 6, kind: input, shape index: {}]   ;;  %s2134_s7 = inlined_call_operand.hbm [shape: f32[2,16,64], index: 7, kind: output, shape index: {}]  }
   0x1   :  { %14 = vsyncpa [#allocation4 + $0x1], 0 }
   0x2   :  { %15 = vsyncpa [#allocation7], 0 }
   0x3   :  { %16 = vsyncpa [#allocation10], 0 }
   0x4   :  { %17 = vsyncpa [#allocation5], 0 }
   0x5   :  { %19 = vsyncpa [#allocation5 + $0x1], 0  ;;  %s1733_s24 = smov 0   ;;  %s1735_s25 = smov 0  }
   0x6   :  { %s1737_s26 = smov 0   ;;  %s1739_s27 = smov 0  }
   0x7 LB: > { %s1754_s28 = sadd.s32 4294967295, %s1678_s27   ;;  %s1178_s29 = sadd.s32 4294967294, %s1678_s27   ;;  %s1678_s27 = sphi %s1739_s27, %s2168_s27   ;;  %s1674_s26 = sphi %s1737_s26, %s2167_s26   ;;  %s1670_s25 = sphi %s1735_s25, %s2166_s25   ;;  %s1666_s24 = sphi %s1733_s24, %s2165_s24  }
   0x8   : > { %p45_p0 = scmp.ne.s32.totalorder %s1670_s25, %s1666_s24  ;;  %p2135_p1 = scmp.eq.s32.totalorder %s1754_s28, 0 }
   0x9   : > { %p201_p3 = scmp.eq.s32.totalorder %s1178_s29, 1  ;;  %p1179_p5 = scmp.ge.s32.totalorder %s1678_s27, 1 }
   0xa   : > { %p1763_p4 = por %p2135_p1, %p45_p0  ;;  %p208_p7 = scmp.lt.s32.totalorder %s1678_s27, 3 }
   0xb   : > { %p1768_p6 = por %p201_p3, %p45_p0  ;;  %s1680_s10 = smov [#allocation6]  }
   0xc   : > { %s2139_s30 = scalar_select %p1763_p4, 1, 0 }
   0xd   : > { %s2140_s8 = scalar_select %p1768_p6, 1, 0 }
   0xe   : > { %p1773_p8 = pnand %p1179_p5, %p208_p7  ;;  %s220_s11 = sshll.u32 %s1680_s10, 4  ;;  %s1777_s11 = int_to_ptr.vmem [resolvable:$true] %s220_s11 }
   0xf   : > { %2141 = sst [smem:[#allocation16_spill]] %s2140_s8  ;;  %s1681_s13 = smov [#allocation8]  }
  0x10   : > { %s2142_s9 = scalar_select %p1773_p8, 1, 0 }
  0x11   : > { %p1387_p9 = pneg %p1773_p8  ;;  %s236_s14 = sshll.u32 %s1681_s13, 4  ;;  %s1788_s14 = int_to_ptr.vmem [resolvable:$true] %s236_s14 }
  0x12   : > { %s1682_s15 = smov [#allocation9]   ;;  %s1490_s19 = scalar_lea.hbm %s2128_s1, 1536 }
  0x13   : > { %p1784_p11 = pnand %p1387_p9, %p2135_p1  ;;  %s1790_s16 = sshll.u32 %s1682_s15, 4  ;;  %s253_s16 = int_to_ptr.vmem [resolvable:$true] %s1790_s16 }
  0x14   : > { %p1491_p12 = scmp.ne.s32.totalorder %s2128_s1, %s1490_s19  ;;  %p1497_p5 = scmp.lt.u32.totalorder %s1490_s19, %s2128_s1 }
  0x15   : > { %p1800_p13 = pneg %p1784_p11 }
  0x17   : > { %p1493_p0 = pnand %p1800_p13, %p1491_p12 }
  0x19   : > { %p1494_p3 = pneg %p1493_p0 }
  0x1b   : > { %p1499_p7 = pnand %p1497_p5, %p1494_p3 }
  0x1d   : > { %1502 = shalt.err (!%p1499_p7)
}
  0x1e   : > { %s1503_s10 = scalar_lea.vmem %s1777_s11, 1536  ;;  %p1511_p2 = scmp.lt.s32.totalorder %s1777_s11, %s1777_s11 }
  0x1f   : > { %p1504_p9 = scmp.ne.s32.totalorder %s1777_s11, %s1503_s10  ;;  %p1512_p6 = scmp.lt.s32.totalorder %s1503_s10, %s1503_s10 }
  0x21   : > { %p1506_p10 = pnand %p1504_p9, %p1800_p13  ;;  %p1513_p12 = por %p1512_p6, %p1511_p2 }
  0x23   : > { %p1507_p1 = pneg %p1506_p10 }
  0x25   : > { %p1514_p0 = pnand %p1513_p12, %p1507_p1 }
  0x27   : > { %1517 = shalt.err (!%p1514_p0)
}
  0x28   : > { %s1683_s13 = smov 64   ;;  %s1684_s15 = smov 4  }
  0x29   : > { %1390 = dma.hbm_to_vmem [thread:$0]  (!%p1784_p11), %s2128_s1, 1536, %s1777_s11, [#allocation7], %s1683_s13, %s1683_s13, %s1684_s15  }
  0x2a   : > { %s1518_s21 = scalar_lea.hbm %s2130_s3, 1536 }
  0x2b   : > { %p1519_p1 = scmp.ne.s32.totalorder %s2130_s3, %s1518_s21  ;;  %p1525_p10 = scmp.lt.u32.totalorder %s1518_s21, %s2130_s3 }
  0x2d   : > { %p1521_p2 = pnand %p1519_p1, %p1800_p13 }
  0x2f   : > { %p1522_p6 = pneg %p1521_p2 }
  0x31   : > { %p1527_p3 = pnand %p1525_p10, %p1522_p6 }
  0x33   : > { %1530 = shalt.err (!%p1527_p3)
}
  0x34   : > { %s1531_s11 = scalar_lea.vmem %s1788_s14, 1536  ;;  %p1539_p12 = scmp.lt.s32.totalorder %s1788_s14, %s1788_s14 }
  0x35   : > { %p1532_p5 = scmp.ne.s32.totalorder %s1788_s14, %s1531_s11  ;;  %p1540_p0 = scmp.lt.s32.totalorder %s1531_s11, %s1531_s11 }
  0x37   : > { %p1534_p7 = pnand %p1532_p5, %p1800_p13  ;;  %p1541_p1 = por %p1540_p0, %p1539_p12 }
  0x39   : > { %p1535_p9 = pneg %p1534_p7 }
  0x3b   : > { %p1542_p2 = pnand %p1541_p1, %p1535_p9 }
  0x3d   : > { %1545 = shalt.err (!%p1542_p2)
}
  0x3e   : > { %1393 = dma.hbm_to_vmem [thread:$0]  (!%p1784_p11), %s2130_s3, 1536, %s1788_s14, [#allocation7], %s1683_s13, %s1683_s13, %s1684_s15  }
  0x3f   : > { %s1546_s20 = scalar_lea.hbm %s2132_s5, 512 }
  0x40   : > { %p1547_p6 = scmp.ne.s32.totalorder %s2132_s5, %s1546_s20  ;;  %p1553_p5 = scmp.lt.u32.totalorder %s1546_s20, %s2132_s5 }
  0x42   : > { %p1549_p10 = pnand %p1547_p6, %p1800_p13 }
  0x44   : > { %p1550_p3 = pneg %p1549_p10 }
  0x46   : > { %p1555_p7 = pnand %p1553_p5, %p1550_p3 }
  0x48   : > { %1558 = shalt.err (!%p1555_p7)
}
  0x49   : > { %s1559_s11 = scalar_lea.vmem %s253_s16, 512  ;;  %p1567_p1 = scmp.lt.s32.totalorder %s253_s16, %s253_s16 }
  0x4a   : > { %p1560_p9 = scmp.ne.s32.totalorder %s253_s16, %s1559_s11  ;;  %p1568_p2 = scmp.lt.s32.totalorder %s1559_s11, %s1559_s11 }
  0x4c   : > { %p1562_p12 = pnand %p1560_p9, %p1800_p13  ;;  %p1569_p4 = por %p1568_p2, %p1567_p1 }
  0x4e   : > { %p1563_p0 = pneg %p1562_p12 }
  0x50   : > { %p1570_p8 = pnand %p1569_p4, %p1563_p0 }
  0x52   : > { %1573 = shalt.err (!%p1570_p8)
}
  0x53   : > { %1396 = dma.hbm_to_vmem [thread:$0]  (!%p1784_p11), %s2132_s5, 512, %s253_s16, [#allocation10], %s1683_s13, %s1683_s13, %s1684_s15  }
  0x54   : > { %s1873_s22 = sadd.s32 1, %s1678_s27   ;;  %s32_s17 = sadd.s32 1, %s1674_s26 }
  0x55   : > { %s29_s12 = ssub.s32 %s1678_s27, %s1873_s22  ;;  %p39_p8 = scmp.ne.s32.totalorder %s1674_s26, %s1670_s25 }
  0x56   : > { %p30_p4 = scmp.eq.s32.totalorder %s29_s12, 0  ;;  %p40_p13 = scmp.eq.s32.totalorder %s1678_s27, 0 }
  0x57   : > { %p1408_p6 = scmp.lt.s32.totalorder %s1678_s27, 2  ;;  %p2145_p3 = scmp.eq.s32.totalorder %s1754_s28, 1 }
  0x58   : > { %s1883_s18 = scalar_select %p30_p4, %s1674_s26, %s32_s17  }
  0x59   : > { %p41_p10 = por %p40_p13, %p39_p8  ;;  %p1887_p5 = por %p2145_p3, %p39_p8 }
  0x5a   : > { %s269_s20 = sand.u32 1, %s1674_s26   ;;  %s1246_s21 = sshll.u32 %s1678_s27, 8 }
  0x5b   : > { %s1184_s16 = sshll.u32 %s269_s20, 4  ;;  %s1896_s23 = scalar_lea.hbm %s2127_s0, %s1246_s21 }
  0x5c   : > { %s273_s29 = scalar_lea.vmem [#allocation3], %s1184_s16  ;;  %p1898_p11 = pnand %p1408_p6, %p41_p10 }
  0x5d   : > { %s280_s10 = sshll.u32 %s273_s29, 4  ;;  %s1904_s14 = scalar_lea.sflag [#allocation4], %s269_s20  ;;  %s1902_s10 = int_to_ptr.vmem [resolvable:$true] %s280_s10 }
  0x5e   : > { %s1574_s8 = scalar_lea.hbm %s1896_s23, 256  ;;  %p1576_p9 = pneg %p1898_p11 }
  0x5f   : > { %p1575_p7 = scmp.ne.s32.totalorder %s1896_s23, %s1574_s8  ;;  %s1579_s21 = scalar_lea.hbm %s2127_s0, 512 }
  0x60   : > { %p1580_p1 = scmp.lt.u32.totalorder %s1896_s23, %s2127_s0  ;;  %p1581_p2 = scmp.lt.u32.totalorder %s1579_s21, %s1574_s8 }
  0x61   : > { %p1577_p12 = pnand %p1576_p9, %p1575_p7  ;;  %p1583_p8 = scmp.lt.u32.totalorder %s1574_s8, %s1896_s23 }
  0x62   : > { %p1582_p4 = por %p1581_p2, %p1580_p1 }
  0x63   : > { %p1578_p0 = pneg %p1577_p12 }
  0x64   : > { %p1584_p13 = por %p1583_p8, %p1582_p4 }
  0x66   : > { %p1585_p6 = pnand %p1584_p13, %p1578_p0 }
  0x68   : > { %1588 = shalt.err (!%p1585_p6)
}
  0x69   : > { %s1589_s20 = scalar_lea.vmem %s1902_s10, 256  ;;  %s1685_s15 = smov [#allocation3]  }
  0x6a   : > { %p1590_p10 = scmp.ne.s32.totalorder %s1902_s10, %s1589_s20  ;;  %s1594_s29 = sshll.u32 %s1685_s15, 4  ;;  %s1595_s29 = int_to_ptr.vmem [resolvable:$false] %s1594_s29 }
  0x6b   : > { %s1596_s12 = scalar_lea.vmem %s1595_s29, 512  ;;  %p1597_p12 = scmp.lt.s32.totalorder %s1902_s10, %s1595_s29 }
  0x6c   : > { %p1592_p3 = pnand %p1590_p10, %p1576_p9  ;;  %p1598_p1 = scmp.lt.s32.totalorder %s1596_s12, %s1589_s20 }
  0x6e   : > { %p1593_p7 = pneg %p1592_p3  ;;  %p1599_p2 = por %p1598_p1, %p1597_p12 }
  0x70   : > { %p1600_p4 = pnand %p1599_p2, %p1593_p7 }
  0x72   : > { %1603 = shalt.err (!%p1600_p4)
}
  0x73   : > { %s1686_s8 = smov 128   ;;  %s1687_s17 = smov 8  }
  0x74   : > { %1400 = dma.hbm_to_vmem [thread:$0]  (!%p1898_p11), %s1896_s23, 256, %s1902_s10, %s1904_s14, %s1686_s8, %s1686_s8, %s1687_s17  }
  0x75   : > { %p2148_p9 = scmp.ne.s32.totalorder %s2142_s9, 0 }
  0x76   : > { %s1935_s21 = sand.u32 (!%p2148_p9), 1, %s1670_s25   ;;  %p2149_p0 = scmp.ne.s32.totalorder (!%p2148_p9), %s2139_s30, 0 }
  0x77   : > { %292 = sbr.rel (%p2148_p9) target bundleno = 901 (0x385), region = 48  ;;  %s1188_s16 = sshll.u32 (!%p2148_p9), %s1935_s21, 4 }
  0x78   : > { %s295_s13 = scalar_lea.sflag (!%p2148_p9), [#allocation4], %s1935_s21  ;;  %s1941_s20 = scalar_lea.vmem (!%p2148_p9), [#allocation3], %s1188_s16 }
  0x7e   : > { %1649 = dma.done.wait (%p2149_p0), %s295_s13, 256  }
  0x7f   : > { %1651 = vsyncadd (%p2149_p0), %s295_s13, 4294967040  ;;  %p2150_p11 = scmp.eq.s32.totalorder %s1754_s28, 0 }
  0x81   : > { %1653 = dma.done.wait (%p2150_p11), [#allocation7], 3072   ;;  %p2151_p8 = pmov %p2150_p11 }
  0x83   : > { %1655 = vsyncadd (%p2151_p8), [#allocation7], 4294964224  ;;  %p2152_p13 = pmov %p2151_p8 }
  0x84   : > { %p2153_p6 = pmov %p2151_p8 }
  0x85   : > { %1657 = dma.done.wait (%p2152_p13), [#allocation10], 512  }
  0x86   : > { %1659 = vsyncadd (%p2153_p6), [#allocation10], 4294966784  ;;  %v1688_v0 = vmov 0.0   ;;  %vm1689_vm0 = vmmov 0   ;;  %vm343_vm1 = vsmask.f32 256 }
  0x87   : > { %1287 = vmatprep.subr.bf16.mxu0 %v1688_v0  ;;  %1299 = vmatprep.subr.bf16.mxu1 %v1688_v0  ;;  %vm348_vm2 = vsmask.f32 7938  ;;  %v1456_v1 = vld [vmem:[#allocation6 + $0x20] sm:$0xff]   ;;  %vm342_vm3 = vcmask 516096   ;;  %v1458_v3 = vld [vmem:[#allocation6 + $0x28] sm:$0xff]   ;;  %v1460_v7 = vld [vmem:[#allocation6 + $0x30] sm:$0xff]  }
  0x88   : > { %1295 = vmatprep.mubr.msk.bf16.mxu0 %vm1689_vm0, %v1688_v0  ;;  %1307 = vmatprep.mubr.msk.bf16.mxu1 %vm1689_vm0, %v1688_v0  ;;  %v1457_v2 = vld [vmem:[#allocation6] sm:$0xff]   ;;  %v1459_v4 = vld [vmem:[#allocation6 + $0x8] sm:$0xff]   ;;  %vm1964_vm4 = vmand %vm342_vm3, %vm343_vm1  ;;  %vm361_vm6 = vsmask.f32 4368  ;;  %vm383_vm7 = vcmask 519168   ;;  %vm458_vm10 = vcmask 523264  }
  0x89   : > { %1288 = vmatpush3.bf16.msra.mxu0 %v1456_v1  ;;  %1300 = vmatpush3.bf16.msra.mxu1 %v1457_v2  ;;  %vm1969_vm5 = vmand %vm342_vm3, %vm348_vm2  ;;  %v1461_v8 = vld [vmem:[#allocation6 + $0x10] sm:$0xff]   ;;  %v350_v10 = vld [vmem:[#allocation2 + $0x8] sm:$0x1]  ;;  %vm421_vm11 = vsmask.f32 7424  ;;  %vm583_vm12 = vcmask 1046528  }
  0x8a   : > { %1289 = vmatprep.subr.bf16.mxu0 %v1688_v0  ;;  %1301 = vmatprep.subr.bf16.mxu1 %v1688_v0  ;;  %v345_v9 = vld [vmem:[#allocation2] sm:$0x1]  ;;  %v1462_v12 = vld [vmem:[#allocation6 + $0x38] sm:$0xff]   ;;  %v351_v14 = vsel %vm1969_vm5, 0, %v350_v10  ;;  %vm1993_vm8 = vmor %vm343_vm1, %vm361_vm6  ;;  %s1251_s15 = sshll.u32 %s1754_s28, 8  ;;  %s340_s29 = scalar_lea.vmem [#allocation11], %s1188_s16 }
  0x8b   : > { %v1976_v11 = vld [vmem:[%s1941_s20] sm:$0xff]  ;;  %v346_v13 = vsel %vm1964_vm4, 0, %v345_v9  ;;  %v1983_v15 = vld [vmem:[%s1941_s20 + $0x8] sm:$0xff]  ;;  %352 = vst [vmem:[#allocation2 + $0x8] sm:$0x1] %v351_v14  ;;  %vm2000_vm9 = vmand %vm383_vm7, %vm348_vm2  ;;  %s1076_s12 = sshll.u32 %s340_s29, 4  ;;  %s2079_s13 = scalar_lea.hbm %s2134_s7, %s1251_s15  ;;  %s2081_s12 = int_to_ptr.vmem [resolvable:$true] %s1076_s12 }
  0x8c   : > { %v1247_v16 = vpack.c.bf16 %v1976_v11, %v1976_v11  ;;  %347 = vst [vmem:[#allocation2] sm:$0x1] %v346_v13  ;;  %v1248_v17 = vpack.c.bf16 %v1983_v15, %v1983_v15  ;;  %v1463_v18 = vld [vmem:[#allocation6 + $0x18] sm:$0xff]   ;;  %v1466_v46 = vld [vmem:[#allocation6 + $0x40] sm:$0xff]   ;;  %v1467_v48 = vld [vmem:[#allocation6 + $0x48] sm:$0xff]   ;;  %s1063_s28 = scalar_lea.sflag [#allocation5], %s1935_s21 }
  0x8d   : > { %1290 = vmatpush3.bf16.msra.mxu0 %v1458_v3  ;;  %1302 = vmatpush3.bf16.msra.mxu1 %v1459_v4  ;;  %v1468_v50 = vld [vmem:[#allocation6 + $0x50] sm:$0xff]   ;;  %v1469_v52 = vld [vmem:[#allocation6 + $0x58] sm:$0xff]   ;;  %v1471_v56 = vld [vmem:[#allocation8] sm:$0xff]   ;;  %s1604_s16 = scalar_lea.vmem %s2081_s12, 256  ;;  %s1690_s20 = smov [#allocation11]  }
  0x8e   : > { %1291 = vmatprep.subr.bf16.mxu0 %v1688_v0  ;;  %1303 = vmatprep.subr.bf16.mxu1 %v1688_v0  ;;  %v364_v19 = vshrl.u32 %v1247_v16, 16  ;;  %v367_v20 = vshll.u32 %v1247_v16, 16  ;;  %v372_v21 = vshrl.u32 %v1248_v17, 16  ;;  %v375_v22 = vshll.u32 %v1248_v17, 16  ;;  %v1472_v57 = vld [vmem:[#allocation8 + $0x8] sm:$0xff]   ;;  %v1473_v58 = vld [vmem:[#allocation8 + $0x20] sm:$0xff]   ;;  %p1605_p10 = scmp.ne.s32.totalorder %s2081_s12, %s1604_s16 }
  0x8f   : > { %v1474_v59 = vld [vmem:[#allocation8 + $0x10] sm:$0xff]   ;;  %v1475_v60 = vld [vmem:[#allocation8 + $0x28] sm:$0xff]   ;;  %v1476_v61 = vld [vmem:[#allocation8 + $0x18] sm:$0xff]   ;;  %s1608_s30 = sshll.u32 %s1690_s20, 4  ;;  %s1609_s30 = int_to_ptr.vmem [resolvable:$false] %s1608_s30 }
  0x90   : > { %v366_v23 = vrot.slane %v364_v19, 7  ;;  %v374_v25 = vrot.slane %v372_v21, 7  ;;  %v1477_v62 = vld [vmem:[#allocation8 + $0x30] sm:$0xff]   ;;  %v1479_v63 = vld [vmem:[#allocation8 + $0x38] sm:$0xff]   ;;  %v1481_v5 = vld [vmem:[#allocation8 + $0x40] sm:$0xff]   ;;  %p1606_p3 = pnand %p1605_p10, %p1887_p5  ;;  %s1610_s9 = scalar_lea.vmem %s1609_s30, 512 }
  0x91   : > { %1292 = vmatpush3.bf16.msra.mxu0 %v1460_v7  ;;  %1304 = vmatpush3.bf16.msra.mxu1 %v1461_v8  ;;  %v1213_v14 = vld [vmem:[%s2129_s2] ss:$0 sm:$0xff]  ;;  %p1611_p12 = scmp.lt.s32.totalorder %s2081_s12, %s1609_s30  ;;  %p1612_p1 = scmp.lt.s32.totalorder %s1610_s9, %s1604_s16 }
  0x92   : > { %1293 = vmatprep.subr.bf16.mxu0 %v1688_v0  ;;  %1305 = vmatprep.subr.bf16.mxu1 %v1688_v0  ;;  %v369_v26 = vor.u32 %v367_v20, %v366_v23  ;;  %v370_v27 = vrot.slane %v366_v23, 4  ;;  %v377_v29 = vor.u32 %v375_v22, %v374_v25  ;;  %v379_v30 = vrot.slane %v374_v25, 4  ;;  %v390_v32 = vld [vmem:[#allocation2 + $0x8] sm:$0x1]  ;;  %p1607_p7 = pneg %p1606_p3 }
  0x93   : > { %v385_v31 = vld [vmem:[#allocation2] sm:$0xf]  ;;  %p1613_p2 = por %p1612_p1, %p1611_p12 }
  0x94   : > { %v378_v33 = vsel %vm1993_vm8, %v370_v27, %v377_v29  ;;  %v386_v34 = vsel %vm2000_vm9, %v369_v26, %v385_v31  ;;  %v391_v35 = vsel %vm1964_vm4, %v379_v30, %v390_v32 }
  0x95   : > { %1294 = vmatpush3.bf16.msra.mxu0 %v1462_v12  ;;  %1306 = vmatpush3.bf16.msra.mxu1 %v1463_v18  ;;  %387 = vst [vmem:[#allocation2] sm:$0xf] %v386_v34  ;;  %389 = vst.msk [vmem:[#allocation2 + $0x4] sm:$0xf] %vm383_vm7, %v378_v33  ;;  %p1614_p4 = pnand %p1613_p2, %p1607_p7 }
  0x96   : > { %1311 = vmatprep.subr.bf16.mxu0 %v1688_v0  ;;  %1323 = vmatprep.subr.bf16.mxu1 %v1688_v0  ;;  %392 = vst [vmem:[#allocation2 + $0x8] sm:$0x1] %v391_v35 }
  0x9c   : > { %v2012_v36 = vld [vmem:[#allocation2] sm:$0xf]  ;;  %v394_v37 = vld [vmem:[#allocation2 + $0x4] sm:$0xf] }
  0x9d   : > { %v1195_v38 = vcombine.low %v2012_v36, %v394_v37  ;;  %v1465_v39 = vld [vmem:[#allocation2 + $0x8] ss:$0 sps:$4 sm:$0x11]   ;;  %v570_v49 = vld [vmem:[#allocation2] sm:$0xe] }
  0x9e   : > { %v430_v42 = vshll.u32 %v1465_v39, 16  ;;  %v1207_v51 = vcombine.low %v570_v49, %v394_v37  ;;  %v585_v54 = vrot.slane %v1465_v39, 1  ;;  %v697_v37 = vld [vmem:[#allocation2 + $0x8] sm:$0x1] }
  0x9f   : > { %v423_v40 = vshrl.u32 %v1195_v38, 16  ;;  %v425_v41 = vshll.u32 %v1195_v38, 16  ;;  %1308 = vmatmul.mubr.msk.bf16.vlgmr.msra.gmra.mrb[0].mxu1 %vm458_vm10, %v1195_v38 }
  0xa0   : > { %1331 = vmatprep.mubr.msk.bf16.mxu1 %vm1689_vm0, %v1688_v0  ;;  %v432_v44 = vrot.slane %v430_v42, 1  ;;  %v584_v53 = vrot.slane %v1207_v51, 1  ;;  %1324 = vmatpush3.bf16.msra.mxu1 %v1473_v58 }
  0xa1   : > { %v427_v43 = vrot.slane %v425_v41, 1  ;;  %1325 = vmatprep.subr.bf16.mxu1 %v1688_v0 }
  0xa2   : > { %v586_v55 = vsel %vm583_vm12, %v584_v53, %v585_v54  ;;  %v1483_v53 = vld [vmem:[#allocation8 + $0x50] sm:$0xff]  }
  0xa3   : > { %v428_v45 = vor.u32 %v427_v43, %v423_v40 }
  0xa4   : > { %1326 = vmatpush3.bf16.msra.mxu1 %v1475_v60  ;;  %v1486_v60 = vld [vmem:[#allocation9] sm:$0xff]  }
  0xa5   : > { %v433_v47 = vsel %vm421_vm11, %v428_v45, %v432_v44  ;;  %1327 = vmatprep.subr.bf16.mxu1 %v1688_v0 }
  0xa6   : > { %1296 = vmatmul.mubr.msk.bf16.vlgmr.msra.gmra.mrb[0].mxu0 %vm458_vm10, %v433_v47 }
  0xa7   : > { %1312 = vmatpush3.bf16.msra.mxu0 %v1466_v46  ;;  %1319 = vmatprep.mubr.msk.bf16.mxu0 %vm1689_vm0, %v1688_v0 }
  0xa8   : > { %1313 = vmatprep.subr.bf16.mxu0 %v1688_v0  ;;  %1328 = vmatpush3.bf16.msra.mxu1 %v1477_v62  ;;  %v1488_v62 = vld [vmem:[#allocation9 + $0x10] sm:$0xff]  }
  0xa9   : > { %1329 = vmatprep.subr.bf16.mxu1 %v1688_v0 }
  0xab   : > { %1314 = vmatpush3.bf16.msra.mxu0 %v1467_v48 }
  0xac   : > { %1315 = vmatprep.subr.bf16.mxu0 %v1688_v0  ;;  %1330 = vmatpush3.bf16.msra.mxu1 %v1479_v63  ;;  %v1489_v63 = vld [vmem:[#allocation9 + $0x18] sm:$0xff]  }
  0xad   : > { %1347 = vmatprep.subr.bf16.mxu1 %v1688_v0 }
  0xaf   : > { %1316 = vmatpush3.bf16.msra.mxu0 %v1468_v50 }
  0xb0   : > { %1317 = vmatprep.subr.bf16.mxu0 %v1688_v0 }
  0xb3   : > { %1318 = vmatpush3.bf16.msra.mxu0 %v1469_v52  ;;  %v1482_v52 = vld [vmem:[#allocation8 + $0x48] sm:$0xff]  }
  0xb4   : > { %1335 = vmatprep.subr.bf16.mxu0 %v1688_v0 }
  0xb6   : > { %1320 = vmatmul.mubr.msk.bf16.vlgmr.msra.gmra.mrb[4].mxu0 %vm458_vm10, %v586_v55 }
  0xb7   : > { %1343 = vmatprep.mubr.msk.bf16.mxu0 %vm1689_vm0, %v1688_v0  ;;  %1336 = vmatpush3.bf16.msra.mxu0 %v1471_v56  ;;  %v1484_v56 = vld [vmem:[#allocation8 + $0x58] sm:$0xff]  }
  0xb8   : > { %1337 = vmatprep.subr.bf16.mxu0 %v1688_v0 }
  0xbb   : > { %1338 = vmatpush3.bf16.msra.mxu0 %v1472_v57 }
  0xbc   : > { %1339 = vmatprep.subr.bf16.mxu0 %v1688_v0 }
  0xbf   : > { %1340 = vmatpush3.bf16.msra.mxu0 %v1474_v59 }
  0xc0   : > { %1341 = vmatprep.subr.bf16.mxu0 %v1688_v0 }
  0xc3   : > { %1342 = vmatpush3.bf16.msra.mxu0 %v1476_v61  ;;  %v1487_v61 = vld [vmem:[#allocation9 + $0x8] sm:$0xff]  }
  0xc4   : > { %1359 = vmatprep.subr.bf16.mxu0 %v1688_v0 }
 0x172   : > { %v563_v1 = vpop.f32.mrb[0].mxu1 }
 0x173   : > { %v1309_v2 = vpop.f32.mrb[1].mxu1 }
 0x174   : > { %v566_v3 = vpop.f32.mrb[2].mxu1 }
 0x175   : > { %v1310_v4 = vpop.f32.mrb[3].mxu1 }
 0x179   : > { %v496_v6 = vpop.f32.mrb[0].mxu0 }
 0x17a   : > { %v564_v7 = vadd.f32 %v563_v1, %v496_v6  ;;  %v1297_v8 = vpop.f32.mrb[1].mxu0 }
 0x17b   : > { %v499_v9 = vpop.f32.mrb[2].mxu0 }
 0x17c   : > { %v567_v10 = vadd.f32 %v566_v3, %v499_v9  ;;  %v1298_v12 = vpop.f32.mrb[3].mxu0 }
 0x189   : > { %v648_v13 = vpop.f32.mrb[4].mxu0 }
 0x18a   : > { %v655_v16 = vadd.f32 %v648_v13, %v564_v7  ;;  %v1321_v17 = vpop.f32.mrb[5].mxu0 }
 0x18b   : > { %v651_v18 = vpop.f32.mrb[6].mxu0 }
 0x18c   : > { %v664_v19 = vadd.f32 %v1213_v14, %v655_v16  ;;  %v656_v20 = vadd.f32 %v651_v18, %v567_v10  ;;  %v1322_v21 = vpop.f32.mrb[7].mxu0 }
 0x18e   : > { %v666_v22 = vmax.f32 %v664_v19, 0.0  ;;  %v665_v23 = vadd.f32 %v1213_v14, %v656_v20  ;;  %v1234_v14 = vld [vmem:[%s2131_s4] ss:$0 sm:$0xff] }
 0x190   : > { %v1249_v25 = vpack.c.bf16 %v666_v22, %v666_v22  ;;  %v667_v26 = vmax.f32 %v665_v23, 0.0 }
 0x192   : > { %v675_v27 = vshrl.u32 %v1249_v25, 16  ;;  %v1250_v29 = vpack.c.bf16 %v667_v26, %v667_v26  ;;  %v678_v31 = vshll.u32 %v1249_v25, 16  ;;  %v1235_v26 = vld [vmem:[%s2133_s6] ss:$0 sm:$0xff] }
 0x194   : > { %v677_v30 = vrot.slane %v675_v27, 7  ;;  %v683_v32 = vshrl.u32 %v1250_v29, 16  ;;  %v686_v35 = vshll.u32 %v1250_v29, 16 }
 0x196   : > { %v680_v33 = vor.u32 %v678_v31, %v677_v30  ;;  %v685_v34 = vrot.slane %v683_v32, 7  ;;  %v681_v38 = vrot.slane %v677_v30, 4 }
 0x198   : > { %v694_v39 = vsel %vm2000_vm9, %v680_v33, %v2012_v36  ;;  %v688_v40 = vor.u32 %v686_v35, %v685_v34  ;;  %v690_v41 = vrot.slane %v685_v34, 4 }
 0x199   : > { %695 = vst [vmem:[#allocation2] sm:$0xf] %v694_v39 }
 0x19a   : > { %v689_v42 = vsel %vm1993_vm8, %v681_v38, %v688_v40  ;;  %v698_v43 = vsel %vm1964_vm4, %v690_v41, %v697_v37 }
 0x19b   : > { %696 = vst.msk [vmem:[#allocation2 + $0x4] sm:$0xf] %vm383_vm7, %v689_v42  ;;  %699 = vst [vmem:[#allocation2 + $0x8] sm:$0x1] %v698_v43 }
 0x1a0   : > { %v700_v44 = vld [vmem:[#allocation2] sm:$0xf] }
 0x1a1   : > { %v875_v54 = vld [vmem:[#allocation2] sm:$0xe] }
 0x1a2   : > { %v701_v45 = vld [vmem:[#allocation2 + $0x4] sm:$0xf]  ;;  %v1480_v47 = vld [vmem:[#allocation2 + $0x8] ss:$0 sps:$4 sm:$0x11]  }
 0x1a3   : > { %v1216_v46 = vcombine.low %v700_v44, %v701_v45  ;;  %v736_v36 = vshll.u32 %v1480_v47, 16  ;;  %v1228_v55 = vcombine.low %v875_v54, %v701_v45  ;;  %v889_v58 = vrot.slane %v1480_v47, 1 }
 0x1a5   : > { %1344 = vmatmul.mubr.msk.bf16.vlgmr.msra.gmra.mrb[8].mxu0 %vm458_vm10, %v1216_v46  ;;  %v731_v28 = vshll.u32 %v1216_v46, 16  ;;  %v729_v48 = vshrl.u32 %v1216_v46, 16  ;;  %v738_v50 = vrot.slane %v736_v36, 1  ;;  %v888_v57 = vrot.slane %v1228_v55, 1 }
 0x1a6   : > { %1367 = vmatprep.mubr.msk.bf16.mxu0 %vm1689_vm0, %v1688_v0  ;;  %1360 = vmatpush3.bf16.msra.mxu0 %v1486_v60 }
 0x1a7   : > { %v733_v24 = vrot.slane %v731_v28, 1  ;;  %v890_v59 = vsel %vm583_vm12, %v888_v57, %v889_v58  ;;  %1361 = vmatprep.subr.bf16.mxu0 %v1688_v0 }
 0x1a9   : > { %v734_v49 = vor.u32 %v733_v24, %v729_v48 }
 0x1aa   : > { %1362 = vmatpush3.bf16.msra.mxu0 %v1487_v61 }
 0x1ab   : > { %v739_v51 = vsel %vm421_vm11, %v734_v49, %v738_v50  ;;  %1363 = vmatprep.subr.bf16.mxu0 %v1688_v0 }
 0x1ac   : > { %1332 = vmatmul.mubr.msk.bf16.vlgmr.msra.gmra.mrb[4].mxu1 %vm458_vm10, %v739_v51 }
 0x1ad   : > { %1348 = vmatpush3.bf16.msra.mxu1 %v1481_v5  ;;  %1355 = vmatprep.mubr.msk.bf16.mxu1 %vm1689_vm0, %v1688_v0 }
 0x1ae   : > { %1349 = vmatprep.subr.bf16.mxu1 %v1688_v0  ;;  %1364 = vmatpush3.bf16.msra.mxu0 %v1488_v62 }
 0x1af   : > { %1365 = vmatprep.subr.bf16.mxu0 %v1688_v0 }
 0x1b1   : > { %1350 = vmatpush3.bf16.msra.mxu1 %v1482_v52 }
 0x1b2   : > { %1351 = vmatprep.subr.bf16.mxu1 %v1688_v0  ;;  %1366 = vmatpush3.bf16.msra.mxu0 %v1489_v63 }
 0x1b5   : > { %1352 = vmatpush3.bf16.msra.mxu1 %v1483_v53 }
 0x1b6   : > { %1353 = vmatprep.subr.bf16.mxu1 %v1688_v0 }
 0x1b9   : > { %1354 = vmatpush3.bf16.msra.mxu1 %v1484_v56 }
 0x1bc   : > { %1356 = vmatmul.mubr.msk.bf16.vlgmr.msra.gmra.mrb[8].mxu1 %vm458_vm10, %v890_v59 }
 0x278   : > { %v868_v1 = vpop.f32.mrb[8].mxu0 }
 0x279   : > { %v1345_v2 = vpop.f32.mrb[9].mxu0 }
 0x27a   : > { %v871_v3 = vpop.f32.mrb[10].mxu0 }
 0x27b   : > { %v1346_v4 = vpop.f32.mrb[11].mxu0 }
 0x27f   : > { %v801_v6 = vpop.f32.mrb[4].mxu1 }
 0x280   : > { %v869_v7 = vadd.f32 %v868_v1, %v801_v6  ;;  %v1333_v8 = vpop.f32.mrb[5].mxu1 }
 0x281   : > { %v804_v9 = vpop.f32.mrb[6].mxu1 }
 0x282   : > { %v872_v10 = vadd.f32 %v871_v3, %v804_v9  ;;  %v1334_v12 = vpop.f32.mrb[7].mxu1 }
 0x28f   : > { %v952_v13 = vpop.f32.mrb[8].mxu1 }
 0x290   : > { %v959_v16 = vadd.f32 %v952_v13, %v869_v7  ;;  %v1357_v17 = vpop.f32.mrb[9].mxu1 }
 0x291   : > { %v955_v0 = vpop.f32.mrb[10].mxu1 }
 0x292   : > { %v968_v18 = vadd.f32 %v1234_v14, %v959_v16  ;;  %v960_v19 = vadd.f32 %v955_v0, %v872_v10  ;;  %v1358_v20 = vpop.f32.mrb[11].mxu1 }
 0x294   : > { %v969_v21 = vadd.f32 %v1234_v14, %v960_v19  ;;  %v970_v22 = vmax.f32 %v968_v18, 0.0 }
 0x296   : > { %v971_v23 = vmax.f32 %v969_v21, 0.0 }
 0x298   : > { %v972_v25 = vpack.c.bf16 %v971_v23, %v970_v22 }
 0x29a   : > { %1368 = vmatmul.mubr.msk.bf16.vlgmr.msra.gmra.mrb[12].mxu0 %vm458_vm10, %v972_v25 }
 0x36d   : > { %v1049_v27 = vpop.f32.mrb[12].mxu0 }
 0x36e   : > { %v1050_v29 = vadd.f32 %v1235_v26, %v1049_v27  ;;  %v1369_v30 = vpop.f32.mrb[13].mxu0 }
 0x36f   : > { %v1052_v31 = vpop.f32.mrb[14].mxu0 }
 0x370   : > { %v1056_v32 = vadd.f32 %v1050_v29, %v1976_v11  ;;  %v1053_v33 = vadd.f32 %v1235_v26, %v1052_v31  ;;  %v1370_v34 = vpop.f32.mrb[15].mxu0 }
 0x372   : > { %v1058_v35 = vmax.f32 %v1056_v32, 0.0  ;;  %v1057_v37 = vadd.f32 %v1053_v33, %v1983_v15 }
 0x374   : > { %1060 = vst.msk [vmem:[%s340_s29] sm:$0xff] %vm458_vm10, %v1058_v35  ;;  %v1059_v11 = vmax.f32 %v1057_v37, 0.0 }
 0x376   : > { %1061 = vst.msk [vmem:[%s340_s29 + $0x8] sm:$0xff] %vm458_vm10, %v1059_v11 }
 0x377   : > { %1617 = shalt.err (!%p1614_p4)
}
 0x378   : > { %s1618_s23 = scalar_lea.hbm %s2079_s13, 256  ;;  %s1622_s14 = scalar_lea.hbm %s2134_s7, 512 }
 0x379   : > { %p1619_p9 = scmp.ne.s32.totalorder %s2079_s13, %s1618_s23  ;;  %p1623_p8 = scmp.lt.u32.totalorder %s2079_s13, %s2134_s7 }
 0x37a   : > { %p1624_p13 = scmp.lt.u32.totalorder %s1622_s14, %s1618_s23  ;;  %p1626_p10 = scmp.lt.u32.totalorder %s1618_s23, %s2079_s13 }
 0x37b   : > { %p1620_p0 = pnand %p1619_p9, %p1887_p5 }
 0x37c   : > { %p1625_p6 = por %p1624_p13, %p1623_p8 }
 0x37d   : > { %p1621_p11 = pneg %p1620_p0 }
 0x37e   : > { %p1627_p3 = por %p1626_p10, %p1625_p6 }
 0x380   : > { %p1628_p7 = pnand %p1627_p3, %p1621_p11 }
 0x382   : > { %1631 = shalt.err (!%p1628_p7)
}
 0x383   : > { %s1691_s8 = smov 128   ;;  %s1692_s17 = smov 8  }
 0x384   : > { %1385 = dma.vmem_to_hbm [thread:$0]  (%p1887_p5), %s2081_s12, 256, %s2079_s13, %s1063_s28, %s1691_s8, %s1691_s8, %s1692_s17  }
 0x385 PF: > { %s2162_s16 = sld [smem:[#allocation16_spill]]  ;;  %s1091_s20 = sand.u32 1, %s1666_s24  }
 0x386   : > { %p2164_p1 = scmp.ge.s32.totalorder %s1678_s27, 2  ;;  %s1092_s30 = scalar_lea.sflag [#allocation5], %s1091_s20 }
 0x38b   : > { %p2163_p12 = scmp.ne.s32.totalorder %s2162_s16, 0 }
 0x38d   : > { %p1402_p2 = pnand %p2164_p1, %p2163_p12 }
 0x38f   : > { %1661 = dma.done.wait (!%p1402_p2), %s1092_s30, 256  }
 0x390   : > { %1663 = vsyncadd (!%p1402_p2), %s1092_s30, 4294967040  ;;  %p22_p4 = scmp.ge.s32.totalorder %s1873_s22, 4   ;;  %s2165_s24 = smov %s1670_s25 }
 0x391   : > { %s2166_s25 = smov %s1674_s26  ;;  %s2167_s26 = smov %s1883_s18 }
 0x392   : > { %s2168_s27 = smov %s1873_s22  ;;  %24 = sbr.rel (!%p22_p4) target bundleno = 7 (0x7), region = 109 }
 0x399   :  { %1097 = vsyncpa [#allocation4], 1 }
 0x39a   :  { %1099 = vsyncpa [#allocation4 + $0x1], 1 }
 0x39b   :  { %1100 = vsyncpa [#allocation7], 1 }
 0x39c   :  { %1101 = vsyncpa [#allocation10], 1 }
 0x39d   :  { %1102 = vsyncpa [#allocation5], 1 }
 0x39e   :  { %1104 = vsyncpa [#allocation5 + $0x1], 1 }

</bundles_post_ra>
